<compile_context>
chip_gen: v5e
topology: v5e:2x2
jax: 0.10.0
libtpu: 0.0.40
codegen_flags: <defaults>
</compile_context>

<pallas_src>
import functools

import jax
import jax.numpy as jnp
from jax.experimental import pallas as pl
from jax.experimental.pallas import tpu as pltpu


def _embed_ln_kernel(tok_ref,        # (tile_m, 1) int32 token ids
                     emb_ref,        # (V, E)      word table (bf16, VMEM resident)
                     pos_ref,        # (S, E)      positional rows 0..S-1 (f32)
                     gamma_ref,      # (1, E)      LayerNorm weight
                     beta_ref,       # (1, E)      LayerNorm bias
                     out_ref,        # (tile_m, E) f32 output tile
                     *, eps):
    tile_m, E = out_ref.shape
    V = emb_ref.shape[0]
    S = pos_ref.shape[0]
    m = tile_m // S                  # whole sequences per tile (static)

    # Vectorized gather: one-hot [tile_m, V] @ table [V, E] on the MXU.
    # Compare in int32 on the VPU (v5e has no bf16 VALU); the 0/1 mask is
    # exact in bf16, so only cast it for the MXU feed.  Accumulate in f32.
    tok = tok_ref[...]                                               # (tile_m, 1)
    onehot = (jax.lax.broadcasted_iota(jnp.int32, (tile_m, V), 1) == tok)
    onehot = onehot.astype(jnp.float32).astype(emb_ref.dtype)        # (tile_m, V)
    word = jnp.dot(onehot, emb_ref[...],
                   preferred_element_type=jnp.float32)               # (tile_m, E) f32

    # Positional add: pos rows repeat every S rows of the flattened tile.
    pos = pos_ref[...]
    if m == 1:
        v = word + pos
    else:
        v = (word.reshape(m, S, E) + pos[None, :, :]).reshape(tile_m, E)

    # LayerNorm over E — single-pass statistics so both cross-lane reductions
    # issue before the centering subtract (var = E[x^2] - mean^2, clamped).
    mean = jnp.mean(v, axis=-1, keepdims=True)
    mean_sq = jnp.mean(v * v, axis=-1, keepdims=True)
    var = jnp.maximum(mean_sq - mean * mean, 0.0)
    normed = (v - mean) * jax.lax.rsqrt(var + eps)

    # Single full-tile, lane- and sublane-dense store.
    out_ref[...] = normed * gamma_ref[...] + beta_ref[...]


def _choose_m(B, S, target_rows=512):
    """Whole sequences per row tile.

    Prefers (a) tiles of <= ~target_rows rows, (b) >= 2 grid steps so v7x's
    two TensorCores both get work, (c) the largest such tile.  tile_m must be
    a multiple of 8 (sublane tiling) unless it covers the whole array.
    """
    candidates = [m for m in range(B, 0, -1)
                  if B % m == 0 and ((m * S) % 8 == 0 or m == B)]
    for m in candidates:                       # >= 2 steps and fits the target
        if B // m >= 2 and m * S <= target_rows:
            return m
    for m in candidates:                       # largest tile that fits the target
        if m * S <= target_rows:
            return m
    # A single sequence already exceeds the target: one sequence per tile if
    # it is sublane-tileable, else fall back to one full-array tile.
    if S % 8 == 0 or B == 1:
        return 1
    return B


def embedding_layer_forward(x, emb_table, pos_table, gamma, beta,
                            *, eps=1e-12, table_dtype=jnp.bfloat16):
    B, S = x.shape
    V, E = emb_table.shape
    max_len, E2 = pos_table.shape
    assert E2 == E and E % 128 == 0
    # torch: word[B,S,E] + pos_emb(arange(x.size(-2)))[1,B,E] — the module's
    # broadcast is only well-defined when x.shape[-2] == seq_len (B == S).
    assert B == S, "the module's positional broadcast requires x.shape[-2] == seq_len"
    assert S <= max_len

    m = _choose_m(B, S)
    tile_m = m * S
    rows = B * S
    n_tiles = rows // tile_m

    tok2d = x.astype(jnp.int32).reshape(rows, 1)
    emb = emb_table.astype(table_dtype)       # bf16 MXU feed; exact under one-hot
    pos = pos_table[:S].astype(jnp.float32)   # full (S, E) block, stays resident
    gamma2d = gamma.reshape(1, E).astype(jnp.float32)
    beta2d = beta.reshape(1, E).astype(jnp.float32)

    # Explicit VMEM budget (BlockSpec inputs are double-buffered by default,
    # which matters on v7x's 64 MiB VMEM once V grows).
    est = (2 * tile_m * 4                                   # token ids
           + 2 * tile_m * E * 4                             # output tile
           + 2 * V * E * jnp.dtype(table_dtype).itemsize    # resident word table
           + 2 * S * E * 4                                  # positional rows
           + 4 * E * 4)                                      # gamma + beta
    vmem_limit = int(min(max(2 * est, 32 << 20), 100 << 20))

    kernel = functools.partial(_embed_ln_kernel, eps=eps)

    # Constant index_maps keep the table / pos / gamma / beta blocks resident in
    # VMEM (Pallas only re-fetches when the block index changes).
    out2d = pl.pallas_call(
        kernel,
        out_shape=jax.ShapeDtypeStruct((rows, E), jnp.float32),
        grid=(n_tiles,),
        in_specs=[
            pl.BlockSpec((tile_m, 1), lambda i: (i, 0)),    # token ids
            pl.BlockSpec((V, E), lambda i: (0, 0)),         # word table (resident)
            pl.BlockSpec((S, E), lambda i: (0, 0)),         # positional rows
            pl.BlockSpec((1, E), lambda i: (0, 0)),         # gamma
            pl.BlockSpec((1, E), lambda i: (0, 0)),         # beta
        ],
        out_specs=pl.BlockSpec((tile_m, E), lambda i: (i, 0)),
        compiler_params=pltpu.CompilerParams(
            dimension_semantics=("parallel",),
            vmem_limit_bytes=vmem_limit),
    )(tok2d, emb, pos, gamma2d, beta2d)

    return out2d.reshape(B, S, E)


def reference_forward(x, emb_table, pos_table, gamma, beta, eps=1e-12):
    word = emb_table[x]                                        # [B, S, E]
    pos = pos_table[jnp.arange(x.shape[-2])][None, :, :]       # [1, P, E]
    v = word + pos
    mean = jnp.mean(v, axis=-1, keepdims=True)
    var = jnp.mean((v - mean) ** 2, axis=-1, keepdims=True)
    return (v - mean) * jax.lax.rsqrt(var + eps) * gamma + beta


if __name__ == "__main__":
    vocab_size, embed_size, max_length = 32, 128, 16
    B, S = 8, 8   # B == S so the module's positional broadcast is valid

    key = jax.random.PRNGKey(0)
    k_tok, k_emb, k_pos = jax.random.split(key, 3)

    x = jax.random.randint(k_tok, (B, S), 0, vocab_size, dtype=jnp.int32)
    emb_table = jax.random.normal(k_emb, (vocab_size, embed_size), jnp.float32)
    pos_table = jax.random.normal(k_pos, (max_length, embed_size), jnp.float32)
    gamma = jnp.ones((embed_size,), jnp.float32)   # nn.LayerNorm default weight
    beta = jnp.zeros((embed_size,), jnp.float32)   # nn.LayerNorm default bias

    out = embedding_layer_forward(x, emb_table, pos_table, gamma, beta)
    out = jax.block_until_ready(out)
    assert out.shape == (B, S, embed_size)

    # Tight parity vs a reference that uses the same bf16-rounded table (the
    # only numeric difference the kernel introduces).
    emb_rounded = emb_table.astype(jnp.bfloat16).astype(jnp.float32)
    ref_bf16 = reference_forward(x, emb_rounded, pos_table, gamma, beta)
    assert jnp.allclose(out, ref_bf16, atol=1e-4, rtol=1e-4), "mismatch vs bf16-table reference"

    # Loose parity vs the exact-f32 module semantics (drift = bf16 table rounding).
    ref_f32 = reference_forward(x, emb_table, pos_table, gamma, beta)
    assert jnp.allclose(out, ref_f32, atol=5e-2, rtol=5e-2), "mismatch vs f32 reference"

    print("KERNEL_OK")
</pallas_src>

<mosaic_0001>
module attributes {stable_mosaic.version = 11 : i64} {
  func.func @_embed_ln_kernel(%arg0: i32, %arg1: memref<32x1xi32, #tpu.memory_space<vmem>>, %arg2: memref<32x128xbf16, #tpu.memory_space<vmem>>, %arg3: memref<8x128xf32, #tpu.memory_space<vmem>>, %arg4: memref<1x128xf32, #tpu.memory_space<vmem>>, %arg5: memref<1x128xf32, #tpu.memory_space<vmem>>, %arg6: memref<32x128xf32, #tpu.memory_space<vmem>>) attributes {dimension_semantics = [#tpu.dimension_semantics<parallel>], iteration_bounds = array<i64: 2>, scalar_prefetch = 0 : i64, scratch_operands = 0 : i64, tpu.core_type = #tpu.core_type<tc>, window_params = [{transform_indices = @transform_0, window_bounds = array<i64: 32, 1>}, {pipeline_mode = #tpu.pipeline_mode<synchronous>, transform_indices = @transform_1, window_bounds = array<i64: 32, 128>}, {pipeline_mode = #tpu.pipeline_mode<synchronous>, transform_indices = @transform_2, window_bounds = array<i64: 8, 128>}, {pipeline_mode = #tpu.pipeline_mode<synchronous>, transform_indices = @transform_3, window_bounds = array<i64: 1, 128>}, {pipeline_mode = #tpu.pipeline_mode<synchronous>, transform_indices = @transform_4, window_bounds = array<i64: 1, 128>}, {transform_indices = @transform_5, window_bounds = array<i64: 32, 128>}]} {
    %c0 = arith.constant 0 : index
    %c0_0 = arith.constant 0 : index
    %0 = vector.load %arg1[%c0, %c0_0] : memref<32x1xi32, #tpu.memory_space<vmem>>, vector<32x1xi32>
    %1 = tpu.iota {dimensions = array<i32: 1>} : vector<32x32xi32>
    %2 = vector.broadcast %0 : vector<32x1xi32> to vector<32x32xi32>
    %3 = arith.cmpi eq, %1, %2 : vector<32x32xi32>
    %4 = arith.extui %3 : vector<32x32xi1> to vector<32x32xi32>
    %5 = arith.sitofp %4 : vector<32x32xi32> to vector<32x32xf32>
    %6 = arith.truncf %5 : vector<32x32xf32> to vector<32x32xbf16>
    %c0_1 = arith.constant 0 : index
    %c0_2 = arith.constant 0 : index
    %7 = vector.load %arg2[%c0_1, %c0_2] : memref<32x128xbf16, #tpu.memory_space<vmem>>, vector<32x128xbf16>
    %cst = arith.constant dense<0.000000e+00> : vector<32x128xf32>
    %8 = tpu.matmul %6, %7, %cst {dimension_numbers = #tpu.dot_dimension_numbers<[1], [0], [0], [1], [0, 0, 1, 1], [], []>} : vector<32x32xbf16>, vector<32x128xbf16>, vector<32x128xf32> -> vector<32x128xf32>
    %c0_3 = arith.constant 0 : index
    %c0_4 = arith.constant 0 : index
    %9 = vector.load %arg3[%c0_3, %c0_4] : memref<8x128xf32, #tpu.memory_space<vmem>>, vector<8x128xf32>
    %10 = vector.shape_cast %8 : vector<32x128xf32> to vector<4x8x128xf32>
    %11 = vector.shape_cast %9 : vector<8x128xf32> to vector<1x8x128xf32>
    %12 = vector.broadcast %11 : vector<1x8x128xf32> to vector<4x8x128xf32>
    %13 = arith.addf %10, %12 : vector<4x8x128xf32>
    %14 = vector.shape_cast %13 : vector<4x8x128xf32> to vector<32x128xf32>
    %cst_5 = arith.constant dense<0.000000e+00> : vector<32xf32>
    %15 = vector.multi_reduction <add>, %14, %cst_5 [1] : vector<32x128xf32> to vector<32xf32>
    %16 = vector.shape_cast %15 : vector<32xf32> to vector<32x1xf32>
    %cst_6 = arith.constant 1.280000e+02 : f32
    %17 = vector.broadcast %cst_6 : f32 to vector<32x1xf32>
    %18 = arith.divf %16, %17 : vector<32x1xf32>
    %19 = arith.mulf %14, %14 : vector<32x128xf32>
    %cst_7 = arith.constant dense<0.000000e+00> : vector<32xf32>
    %20 = vector.multi_reduction <add>, %19, %cst_7 [1] : vector<32x128xf32> to vector<32xf32>
    %21 = vector.shape_cast %20 : vector<32xf32> to vector<32x1xf32>
    %cst_8 = arith.constant 1.280000e+02 : f32
    %22 = vector.broadcast %cst_8 : f32 to vector<32x1xf32>
    %23 = arith.divf %21, %22 : vector<32x1xf32>
    %24 = arith.mulf %18, %18 : vector<32x1xf32>
    %25 = arith.subf %23, %24 : vector<32x1xf32>
    %cst_9 = arith.constant 0.000000e+00 : f32
    %26 = vector.broadcast %cst_9 : f32 to vector<32x1xf32>
    %27 = arith.maximumf %25, %26 : vector<32x1xf32>
    %28 = vector.broadcast %18 : vector<32x1xf32> to vector<32x128xf32>
    %29 = arith.subf %14, %28 : vector<32x128xf32>
    %cst_10 = arith.constant 9.99999996E-13 : f32
    %30 = vector.broadcast %cst_10 : f32 to vector<32x1xf32>
    %31 = arith.addf %27, %30 : vector<32x1xf32>
    %32 = math.rsqrt %31 : vector<32x1xf32>
    %33 = vector.broadcast %32 : vector<32x1xf32> to vector<32x128xf32>
    %34 = arith.mulf %29, %33 : vector<32x128xf32>
    %c0_11 = arith.constant 0 : index
    %c0_12 = arith.constant 0 : index
    %35 = vector.load %arg4[%c0_11, %c0_12] : memref<1x128xf32, #tpu.memory_space<vmem>>, vector<1x128xf32>
    %36 = vector.broadcast %35 : vector<1x128xf32> to vector<32x128xf32>
    %37 = arith.mulf %34, %36 : vector<32x128xf32>
    %c0_13 = arith.constant 0 : index
    %c0_14 = arith.constant 0 : index
    %38 = vector.load %arg5[%c0_13, %c0_14] : memref<1x128xf32, #tpu.memory_space<vmem>>, vector<1x128xf32>
    %39 = vector.broadcast %38 : vector<1x128xf32> to vector<32x128xf32>
    %40 = arith.addf %37, %39 : vector<32x128xf32>
    %c0_15 = arith.constant 0 : index
    %c0_16 = arith.constant 0 : index
    %41 = vector.load %arg6[%c0_15, %c0_16] : memref<32x128xf32, #tpu.memory_space<vmem>>, vector<32x128xf32>
    tpu.vector_store %arg6[%c0_15, %c0_16], %40 {strides = array<i32>} : memref<32x128xf32, #tpu.memory_space<vmem>>, vector<32x128xf32>,
    return
  }
  func.func @transform_0(%arg0: i32) -> (i32, i32) {
    %c0_i32 = arith.constant 0 : i32
    %c0_i32_0 = arith.constant 0 : i32
    return %arg0, %c0_i32 : i32, i32
  }
  func.func @transform_1(%arg0: i32) -> (i32, i32) {
    %c0_i32 = arith.constant 0 : i32
    %c0_i32_0 = arith.constant 0 : i32
    %c0_i32_1 = arith.constant 0 : i32
    return %c0_i32, %c0_i32_0 : i32, i32
  }
  func.func @transform_2(%arg0: i32) -> (i32, i32) {
    %c0_i32 = arith.constant 0 : i32
    %c0_i32_0 = arith.constant 0 : i32
    %c0_i32_1 = arith.constant 0 : i32
    return %c0_i32, %c0_i32_0 : i32, i32
  }
  func.func @transform_3(%arg0: i32) -> (i32, i32) {
    %c0_i32 = arith.constant 0 : i32
    %c0_i32_0 = arith.constant 0 : i32
    %c0_i32_1 = arith.constant 0 : i32
    return %c0_i32, %c0_i32_0 : i32, i32
  }
  func.func @transform_4(%arg0: i32) -> (i32, i32) {
    %c0_i32 = arith.constant 0 : i32
    %c0_i32_0 = arith.constant 0 : i32
    %c0_i32_1 = arith.constant 0 : i32
    return %c0_i32, %c0_i32_0 : i32, i32
  }
  func.func @transform_5(%arg0: i32) -> (i32, i32) {
    %c0_i32 = arith.constant 0 : i32
    %c0_i32_0 = arith.constant 0 : i32
    return %arg0, %c0_i32 : i32, i32
  }
}

</mosaic_0001>

<bundles_post_ra>
// kernel: tpu_custom_call.1
= control target key start
LH: loop header
LB: loop body
LE: loop exit
PB: predicated region body
PF: predicated region fallthrough
CT: control target
= control target key end

     0   :  { %10 = vsyncpa [#allocation3], 0  ;;  %s835_s0 = inlined_call_operand.vmem [shape: s32[64,1], index: 0, kind: input, shape index: {}]   ;;  %s836_s1 = inlined_call_operand.vmem [shape: bf16[32,128], index: 1, kind: input, shape index: {}]   ;;  %s837_s2 = inlined_call_operand.vmem [shape: f32[8,128], index: 2, kind: input, shape index: {}]   ;;  %s838_s3 = inlined_call_operand.vmem [shape: f32[1,128], index: 3, kind: input, shape index: {}]   ;;  %s839_s4 = inlined_call_operand.vmem [shape: f32[1,128], index: 4, kind: input, shape index: {}]   ;;  %s840_s5 = inlined_call_operand.hbm [shape: f32[64,128], index: 5, kind: output, shape index: {}]  }
   0x1   :  { %12 = vsyncpa [#allocation3 + $0x1], 0  ;;  %s691_s18 = smov 0   ;;  %s693_s19 = smov 0  }
   0x2   :  { %s695_s20 = smov 0   ;;  %s697_s21 = smov 0  }
   0x3 LB: > { %s712_s22 = sadd.s32 4294967295, %s654_s21   ;;  %s503_s23 = sadd.s32 4294967294, %s654_s21   ;;  %s654_s21 = sphi %s697_s21, %s846_s21   ;;  %s650_s20 = sphi %s695_s20, %s845_s20   ;;  %s646_s19 = sphi %s693_s19, %s844_s19   ;;  %s642_s18 = sphi %s691_s18, %s843_s18  }
   0x4   : > { %s716_s24 = sadd.s32 1, %s654_s21   ;;  %s135_s25 = sadd.s32 1, %s650_s20 }
   0x5   : > { %s132_s26 = ssub.s32 %s654_s21, %s716_s24  ;;  %p145_p0 = scmp.ne.s32.totalorder %s650_s20, %s646_s19 }
   0x6   : > { %p133_p1 = scmp.eq.s32.totalorder %s132_s26, 0  ;;  %p146_p2 = scmp.eq.s32.totalorder %s712_s22, 1 }
   0x7   : > { %p151_p3 = scmp.ne.s32.totalorder %s646_s19, %s642_s18  ;;  %p152_p4 = scmp.eq.s32.totalorder %s503_s23, 1 }
   0x8   : > { %s727_s27 = scalar_select %p133_p1, %s650_s20, %s135_s25  }
   0x9   : > { %p729_p5 = por %p146_p2, %p145_p0  ;;  %p733_p6 = por %p152_p4, %p151_p3 }
   0xa   : > { %p506_p7 = scmp.ge.s32.totalorder %s654_s21, 1  ;;  %p191_p8 = scmp.lt.s32.totalorder %s654_s21, 3 }
   0xc   : > { %p192_p9 = pnand %p506_p7, %p191_p8 }
   0xd   : > { %s508_s30 = sshll.u32 (!%p192_p9), %s712_s22, 2  ;;  %s216_s16 = sand.u32 (!%p192_p9), 1, %s646_s19  }
   0xe   : > { %195 = sbr.rel (%p192_p9) target bundleno = 470 (0x1d6), region = 40  ;;  %p220_p10 = scmp.lt.s32.totalorder (!%p192_p9), %s508_s30, 7 }
   0xf   : > { %s531_s7 = sshll.u32 (!%p192_p9), %s712_s22, 5  ;;  %s426_s12 = scalar_lea.sflag (!%p192_p9), [#allocation3], %s216_s16 }
  0x10   : > { %s437_s10 = scalar_lea.hbm (!%p192_p9), %s840_s5, %s531_s7  ;;  %s612_s23 = scalar_lea.hbm (!%p192_p9), %s840_s5, 64 }
  0x11   : > { %s440_s11 = sshll.u32 (!%p192_p9), %s437_s10, 4  ;;  %s441_s11 = int_to_ptr.hbm [resolvable:$true] %s440_s11 }
  0x12   : > { %s606_s13 = sshra.s32 (!%p192_p9), %s441_s11, 4  ;;  %s607_s13 = int_to_ptr.hbm [resolvable:$true] %s606_s13 }
  0x13   : > { %v656_v0 = vmov 0   ;;  %s848_s30 = smov (!%p220_p10, %s508_s30), 7  ;;  %v530_v5 = vld [vmem:[%s836_s1 + $0x8] sm:$0xff]  ;;  %v529_v6 = vld [vmem:[%s836_s1] sm:$0xff]  ;;  %v231_v7 = vlaneseq  ;;  %v657_v11 = vmov 0.0   ;;  %vm275_vm4 = vcmask 261120   ;;  %p613_p0 = scmp.lt.s32.totalorder %s607_s13, %s840_s5 }
  0x14   : > { %579 = vset.pattern.permute.xlu1 %v656_v0  ;;  %578 = vset.pattern.permute.xlu0 %v656_v0  ;;  %s509_s6 = sshll.u32 %s848_s30, 3  ;;  %v301_v20 = vld [vmem:[%s837_s2] sm:$0xff]  ;;  %v658_v33 = vmov 128.0   ;;  %s507_s30 = sshll.u32 %s216_s16, 5 }
  0x15   : > { %s223_s9 = scalar_lea.vmem %s835_s0, %s509_s6  ;;  %288 = vmatpush.bf16.msra.mxu0 %v530_v5  ;;  %532 = vmatpush.bf16.msra.mxu1 %v530_v5  ;;  %v232_v10 = vand.u32 127, %v231_v7  ;;  %582 = vrcp.f32 %v658_v33  ;;  %s791_s6 = scalar_lea.vmem [#allocation2], %s507_s30 }
  0x16   : > { %v229_v1 = vld [vmem:[%s223_s9 + $0x10] sm:$0xff]  ;;  %v227_v2 = vld [vmem:[%s223_s9] sm:$0xff]  ;;  %v230_v3 = vld [vmem:[%s223_s9 + $0x18] sm:$0xff]  ;;  %s438_s22 = sshll.u32 %s791_s6, 4  ;;  %s608_s14 = scalar_lea.hbm %s607_s13, 32  ;;  %s439_s22 = int_to_ptr.vmem [resolvable:$true] %s438_s22 }
  0x17   : > { %240 = vperm.xlu1 %579, %v229_v1   ;;  %234 = vperm.xlu0 %578, %v227_v2   ;;  %v228_v4 = vld [vmem:[%s223_s9 + $0x8] sm:$0xff]  ;;  %p609_p11 = scmp.ne.s32.totalorder %s607_s13, %s608_s14  ;;  %p614_p1 = scmp.lt.s32.totalorder %s612_s23, %s608_s14 }
  0x19   : > { %289 = vmatpush.bf16.msra.mxu0 %v529_v6  ;;  %533 = vmatpush.bf16.msra.mxu1 %v529_v6  ;;  %p610_p12 = pnand %p609_p11, %p729_p5  ;;  %p615_p2 = por %p614_p1, %p613_p0 }
  0x1b   : > { %v583_v34 = vpop.eup %582  ;;  %p611_p13 = pneg %p610_p12 }
  0x1c   : > { %v315_v35 = vmul.f32 128.0, %v583_v34  ;;  %vm319_vm5 = vweird.f32 %v583_v34 }
  0x1d   : > { %p616_p3 = pnand %p615_p2, %p611_p13 }
  0x1e   : > { %v316_v36 = vsub.f32 1.0, %v315_v35 }
  0x1f   : > { %243 = vperm.xlu1 %579, %v230_v3   ;;  %237 = vperm.xlu0 %578, %v228_v4  }
  0x20   : > { %v317_v38 = vmul.f32 %v583_v34, %v316_v36 }
  0x22   : > { %v318_v39 = vadd.f32 %v583_v34, %v317_v38 }
  0x24   : > { %v320_v41 = vsel %vm319_vm5, %v583_v34, %v318_v39 }
  0x89   : > { %v241_v8 = vpop.permute.xlu1 %240  ;;  %v235_v9 = vpop.permute.xlu0 %234 }
  0x8a   : > { %vm247_vm0 = vcmp.eq.s32.totalorder %v232_v10, %v241_v8  ;;  %vm245_vm1 = vcmp.eq.s32.totalorder %v232_v10, %v235_v9 }
  0x8b   : > { %v512_v12 = vsel %vm247_vm0, 1.0, %v657_v11  ;;  %v510_v15 = vsel %vm245_vm1, 1.0, %v657_v11 }
  0x91   : > { %v244_v13 = vpop.permute.xlu1 %243  ;;  %v238_v14 = vpop.permute.xlu0 %237 }
  0x92   : > { %vm248_vm2 = vcmp.eq.s32.totalorder %v232_v10, %v244_v13  ;;  %vm246_vm3 = vcmp.eq.s32.totalorder %v232_v10, %v238_v14  ;;  %v580_v13 = vld [vmem:[%s838_s3] ss:$0 sm:$0xff] }
  0x93   : > { %v513_v16 = vsel %vm248_vm2, 1.0, %v657_v11  ;;  %v511_v17 = vsel %vm246_vm3, 1.0, %v657_v11 }
  0x94   : > { %v258_v18 = vpack.c.bf16 %v513_v16, %v512_v12  ;;  %v257_v19 = vpack.c.bf16 %v511_v17, %v510_v15  ;;  %v581_v17 = vld [vmem:[%s839_s4] ss:$0 sm:$0xff] }
  0x96   : > { %522 = vmatmul.msk.bf16.vlgmr.msra.gmra.mxu0 %vm275_vm4, %v257_v19  ;;  %523 = vmatmul.msk.bf16.vlgmr.msra.gmra.mxu1 %vm275_vm4, %v258_v18 }
 0x113   : > { %v291_v21 = vpop.f32.mrf.mxu0  ;;  %v296_v22 = vpop.f32.mrf.mxu1 }
 0x114   : > { %v752_v23 = vadd.f32 %v301_v20, %v291_v21  ;;  %v754_v24 = vadd.f32 %v301_v20, %v296_v22 }
 0x116   : > { %310 = vadd.xlane.f32.xlu0 %v754_v24  ;;  %306 = vadd.xlane.f32.xlu2 %v752_v23  ;;  %v325_v29 = vmul.f32 %v752_v23, %v752_v23  ;;  %v327_v30 = vmul.f32 %v754_v24, %v754_v24 }
 0x11b   : > { %v293_v25 = vpop.f32.mrf.mxu0  ;;  %v298_v26 = vpop.f32.mrf.mxu1 }
 0x11c   : > { %v758_v27 = vadd.f32 %v301_v20, %v293_v25  ;;  %v760_v28 = vadd.f32 %v301_v20, %v298_v26 }
 0x11e   : > { %312 = vadd.xlane.f32.xlu1 %v760_v28  ;;  %308 = vadd.xlane.f32.xlu2 %v758_v27  ;;  %v326_v31 = vmul.f32 %v758_v27, %v758_v27  ;;  %v328_v32 = vmul.f32 %v760_v28, %v760_v28 }
 0x126   : > { %329 = vadd.xlane.f32.xlu2 %v325_v29 }
 0x12e   : > { %333 = vadd.xlane.f32.xlu2 %v327_v30 }
 0x136   : > { %331 = vadd.xlane.f32.xlu2 %v326_v31 }
 0x13e   : > { %335 = vadd.xlane.f32.xlu2 %v328_v32 }
 0x189   : > { %v307_v37 = vpop.xlane.xlu2 %306  ;;  %v311_v47 = vpop.xlane.xlu0 %310 }
 0x18a   : > { %v321_v42 = vmul.f32 %v320_v41, %v307_v37  ;;  %v323_v49 = vmul.f32 %v320_v41, %v311_v47 }
 0x18c   : > { %v341_v44 = vmul.f32 %v321_v42, %v321_v42  ;;  %v343_v52 = vmul.f32 %v323_v49, %v323_v49  ;;  %v353_v11 = vsub.f32 %v752_v23, %v321_v42  ;;  %v355_v32 = vsub.f32 %v754_v24, %v323_v49 }
 0x191   : > { %v309_v40 = vpop.xlane.xlu2 %308  ;;  %v313_v1 = vpop.xlane.xlu1 %312 }
 0x192   : > { %v772_v55 = vmul.f32 %v320_v41, %v309_v40  ;;  %v776_v6 = vmul.f32 %v320_v41, %v313_v1 }
 0x194   : > { %v342_v61 = vmul.f32 %v772_v55, %v772_v55  ;;  %v344_v12 = vmul.f32 %v776_v6, %v776_v6  ;;  %v354_v42 = vsub.f32 %v758_v27, %v772_v55  ;;  %v356_v27 = vsub.f32 %v760_v28, %v776_v6 }
 0x199   : > { %v330_v43 = vpop.xlane.xlu2 %329 }
 0x19a   : > { %v337_v45 = vmul.f32 %v330_v43, %v320_v41 }
 0x19c   : > { %v345_v46 = vsub.f32 %v337_v45, %v341_v44 }
 0x19e   : > { %v349_v48 = vmax.f32 %v345_v46, 0.0 }
 0x1a0   : > { %v357_v50 = vadd.f32 1e-12, %v349_v48 }
 0x1a1   : > { %v334_v51 = vpop.xlane.xlu2 %333 }
 0x1a2   : > { %584 = vrsqrt.f32 %v357_v50  ;;  %v339_v53 = vmul.f32 %v334_v51, %v320_v41  ;;  %vm367_vm7 = vweird.f32 %v357_v50 }
 0x1a4   : > { %v347_v54 = vsub.f32 %v339_v53, %v343_v52 }
 0x1a6   : > { %v351_v56 = vmax.f32 %v347_v54, 0.0 }
 0x1a8   : > { %v585_v57 = vpop.eup %584  ;;  %v359_v58 = vadd.f32 1e-12, %v351_v56 }
 0x1a9   : > { %v362_v59 = vmul.f32 %v585_v57, %v357_v50  ;;  %v332_v60 = vpop.xlane.xlu2 %331  ;;  %vm368_vm6 = vweird.f32 %v585_v57 }
 0x1aa   : > { %586 = vrsqrt.f32 %v359_v58  ;;  %v338_v62 = vmul.f32 %v332_v60, %v320_v41  ;;  %vm369_vm8 = vmor %vm367_vm7, %vm368_vm6  ;;  %vm387_vm10 = vweird.f32 %v359_v58 }
 0x1ab   : > { %v363_v63 = vmul.f32 %v585_v57, %v362_v59 }
 0x1ac   : > { %v346_v0 = vsub.f32 %v338_v62, %v342_v61 }
 0x1ad   : > { %v364_v2 = vmul.f32 0.5, %v363_v63 }
 0x1ae   : > { %v350_v3 = vmax.f32 %v346_v0, 0.0 }
 0x1af   : > { %v365_v4 = vsub.f32 1.5, %v364_v2 }
 0x1b0   : > { %v587_v5 = vpop.eup %586  ;;  %v358_v7 = vadd.f32 1e-12, %v350_v3 }
 0x1b1   : > { %v366_v8 = vmul.f32 %v585_v57, %v365_v4  ;;  %v382_v9 = vmul.f32 %v587_v5, %v359_v58  ;;  %v336_v10 = vpop.xlane.xlu2 %335  ;;  %vm388_vm9 = vweird.f32 %v587_v5 }
 0x1b2   : > { %588 = vrsqrt.f32 %v358_v7  ;;  %v340_v14 = vmul.f32 %v336_v10, %v320_v41  ;;  %vm389_vm11 = vmor %vm387_vm10, %vm388_vm9  ;;  %vm377_vm13 = vweird.f32 %v358_v7 }
 0x1b3   : > { %v370_v15 = vsel %vm369_vm8, %v585_v57, %v366_v8  ;;  %v383_v16 = vmul.f32 %v587_v5, %v382_v9 }
 0x1b4   : > { %v401_v18 = vmul.f32 %v370_v15, %v353_v11  ;;  %v348_v19 = vsub.f32 %v340_v14, %v344_v12 }
 0x1b5   : > { %v384_v20 = vmul.f32 0.5, %v383_v16 }
 0x1b6   : > { %v409_v21 = vmul.f32 %v580_v13, %v401_v18  ;;  %v352_v22 = vmax.f32 %v348_v19, 0.0 }
 0x1b7   : > { %v385_v23 = vsub.f32 1.5, %v384_v20 }
 0x1b8   : > { %v589_v25 = vpop.eup %588  ;;  %v417_v26 = vadd.f32 %v581_v17, %v409_v21  ;;  %v360_v29 = vadd.f32 1e-12, %v352_v22 }
 0x1b9   : > { %v386_v30 = vmul.f32 %v587_v5, %v385_v23  ;;  %v372_v31 = vmul.f32 %v589_v25, %v358_v7  ;;  %vm378_vm12 = vweird.f32 %v589_v25 }
 0x1ba   : > { %421 = vst [vmem:[%s791_s6] sm:$0xff] %v417_v26  ;;  %590 = vrsqrt.f32 %v360_v29  ;;  %vm379_vm14 = vmor %vm377_vm13, %vm378_vm12  ;;  %vm397_vm0 = vweird.f32 %v360_v29 }
 0x1bb   : > { %v390_v33 = vsel %vm389_vm11, %v587_v5, %v386_v30  ;;  %v373_v34 = vmul.f32 %v589_v25, %v372_v31 }
 0x1bc   : > { %v403_v35 = vmul.f32 %v390_v33, %v355_v32 }
 0x1bd   : > { %v374_v36 = vmul.f32 0.5, %v373_v34 }
 0x1be   : > { %v411_v37 = vmul.f32 %v580_v13, %v403_v35 }
 0x1bf   : > { %v375_v38 = vsub.f32 1.5, %v374_v36 }
 0x1c0   : > { %v591_v39 = vpop.eup %590  ;;  %v419_v40 = vadd.f32 %v581_v17, %v411_v37 }
 0x1c1   : > { %v376_v41 = vmul.f32 %v589_v25, %v375_v38  ;;  %v392_v24 = vmul.f32 %v591_v39, %v360_v29  ;;  %vm398_vm15 = vweird.f32 %v591_v39 }
 0x1c2   : > { %423 = vst [vmem:[%s791_s6 + $0x10] sm:$0xff] %v419_v40  ;;  %vm399_vm1 = vmor %vm397_vm0, %vm398_vm15 }
 0x1c3   : > { %v380_v43 = vsel %vm379_vm14, %v589_v25, %v376_v41  ;;  %v393_v44 = vmul.f32 %v591_v39, %v392_v24 }
 0x1c4   : > { %v402_v45 = vmul.f32 %v380_v43, %v354_v42 }
 0x1c5   : > { %v394_v46 = vmul.f32 0.5, %v393_v44 }
 0x1c6   : > { %v410_v47 = vmul.f32 %v580_v13, %v402_v45 }
 0x1c7   : > { %v395_v48 = vsub.f32 1.5, %v394_v46 }
 0x1c8   : > { %v418_v49 = vadd.f32 %v581_v17, %v410_v47 }
 0x1c9   : > { %v396_v50 = vmul.f32 %v591_v39, %v395_v48 }
 0x1ca   : > { %422 = vst [vmem:[%s791_s6 + $0x8] sm:$0xff] %v418_v49 }
 0x1cb   : > { %v400_v51 = vsel %vm399_vm1, %v591_v39, %v396_v50 }
 0x1cc   : > { %v404_v52 = vmul.f32 %v400_v51, %v356_v27 }
 0x1ce   : > { %v412_v53 = vmul.f32 %v580_v13, %v404_v52 }
 0x1d0   : > { %v420_v54 = vadd.f32 %v581_v17, %v412_v53 }
 0x1d2   : > { %424 = vst [vmem:[%s791_s6 + $0x18] sm:$0xff] %v420_v54 }
 0x1d3   : > { %619 = shalt.err (!%p616_p3)
}
 0x1d4   : > { %s659_s16 = smov 128   ;;  %s660_s30 = smov 8  }
 0x1d5   : > { %534 = dma.vmem_to_hbm [thread:$0]  (%p729_p5), %s439_s22, 512, %s441_s11, %s426_s12, %s659_s16, %s659_s16, %s660_s30  }
 0x1d6 PF: > { %p540_p4 = scmp.ge.s32.totalorder %s654_s21, 2  ;;  %s455_s6 = sand.u32 1, %s642_s18  }
 0x1d7   : > { %s456_s7 = scalar_lea.sflag [#allocation3], %s455_s6 }
 0x1d8   : > { %p537_p7 = pnand %p540_p4, %p733_p6 }
 0x1da   : > { %p538_p8 = pneg %p537_p7 }
 0x1dc   : > { %637 = dma.done.wait (%p538_p8), %s456_s7, 512  }
 0x1dd   : > { %639 = vsyncadd (%p538_p8), %s456_s7, 4294966784  ;;  %p15_p9 = scmp.ge.s32.totalorder %s716_s24, 4   ;;  %s843_s18 = smov %s646_s19 }
 0x1de   : > { %s844_s19 = smov %s650_s20  ;;  %s845_s20 = smov %s727_s27 }
 0x1df   : > { %s846_s21 = smov %s716_s24  ;;  %17 = sbr.rel (!%p15_p9) target bundleno = 3 (0x3), region = 75 }
 0x1e4   :  { %462 = vsyncpa [#allocation3], 1 }
 0x1e5   :  { %464 = vsyncpa [#allocation3 + $0x1], 1 }

</bundles_post_ra>
